<compile_context>
chip_gen: v6e
topology: v6e:2x2x1
jax: 0.10.0
libtpu: 0.0.40
codegen_flags: <defaults>
</compile_context>

<pallas_src>
import functools

import jax
import jax.numpy as jnp
from jax.experimental import pallas as pl
from jax.experimental.pallas import tpu as pltpu


def _round_up(x: int, m: int) -> int:
    return ((x + m - 1) // m) * m


def _linear_kernel(x_ref, w_ref, b_ref, o_ref, acc_ref):
    # grid = (i over M tiles, j over out tiles, k over K tiles); K last + arbitrary.
    k = pl.program_id(2)

    @pl.when(k == 0)
    def _():
        acc_ref[...] = jnp.zeros_like(acc_ref)

    # x tile: (tm, tk); w tile: (tn, tk) in PyTorch (out, in) layout.
    # Contract dim 1 of both -> (tm, tn); no wrapper-side transpose needed.
    acc_ref[...] += jax.lax.dot_general(
        x_ref[...],
        w_ref[...],
        dimension_numbers=(((1,), (1,)), ((), ())),
        preferred_element_type=jnp.float32,
    )

    @pl.when(k == pl.num_programs(2) - 1)
    def _():
        # Bias added exactly once, in the finalize branch.
        o_ref[...] = (acc_ref[...] + b_ref[...]).astype(o_ref.dtype)


@functools.partial(jax.jit, static_argnames=("tm", "tn", "tk"))
def linear_forward(x, weight, bias, *, tm=None, tn=None, tk=None):
    """y = x @ weight.T + bias  (PyTorch nn.Linear semantics).

    x: (N, in_features); weight: (out_features, in_features); bias: (out_features,).
    """
    n, in_f = x.shape
    out_f, in_f_w = weight.shape
    assert in_f_w == in_f
    assert bias.shape == (out_f,)

    # Tile sizes: sublane (M) multiple of 8, lane (N/K) multiples of 128 so the
    # output is lane-dense and MXU tiles are well shaped; capped so the
    # double-buffered working set fits comfortably in VMEM on all chips
    # (including v7x's 64 MiB per-TC VMEM).
    if tm is None:
        tm = min(256, _round_up(n, 8))
    if tn is None:
        tn = min(256, _round_up(out_f, 128))
    if tk is None:
        tk = min(512, _round_up(in_f, 128))

    # Zero-pad every dim up to a multiple of its tile (zeros contribute nothing
    # to the matmul; padded output rows/cols are sliced off below). Zero-width
    # pads are no-ops, so aligned shapes pay nothing here.
    n_p = _round_up(n, tm)
    k_p = _round_up(in_f, tk)
    m_p = _round_up(out_f, tn)
    x_p = jnp.pad(x, ((0, n_p - n), (0, k_p - in_f)))
    w_p = jnp.pad(weight, ((0, m_p - out_f), (0, k_p - in_f)))
    b_p = jnp.pad(bias, (0, m_p - out_f)).reshape(1, m_p).astype(x.dtype)

    grid = (n_p // tm, m_p // tn, k_p // tk)

    # VMEM budget: double-buffered input/output tiles + f32 accumulator + headroom.
    tile_bytes = 4 * (tm * tk + tn * tk + tn + tm * tn)
    vmem_limit = min(max(2 * tile_bytes + 4 * tm * tn + (8 << 20), 16 << 20), 64 << 20)

    out_p = pl.pallas_call(
        _linear_kernel,
        out_shape=jax.ShapeDtypeStruct((n_p, m_p), x.dtype),
        grid_spec=pltpu.PrefetchScalarGridSpec(
            num_scalar_prefetch=0,
            grid=grid,
            in_specs=[
                pl.BlockSpec((tm, tk), lambda i, j, k: (i, k)),  # x
                pl.BlockSpec((tn, tk), lambda i, j, k: (j, k)),  # weight (out, in)
                pl.BlockSpec((1, tn), lambda i, j, k: (0, j)),   # bias
            ],
            out_specs=pl.BlockSpec((tm, tn), lambda i, j, k: (i, j)),
            scratch_shapes=[pltpu.VMEM((tm, tn), jnp.float32)],
        ),
        compiler_params=pltpu.CompilerParams(
            dimension_semantics=("parallel", "parallel", "arbitrary"),
            vmem_limit_bytes=vmem_limit,
        ),
    )(x_p, w_p, b_p)

    return out_p[:n, :out_f]


if __name__ == "__main__":
    key = jax.random.PRNGKey(0)

    # Shapes implied by the module's use on the Boston 'RM' feature:
    # input_size=1, output_size=1, small batch; weight/bias initialized to 1.0.
    input_size, output_size, batch = 1, 1, 8
    x = jax.random.normal(key, (batch, input_size), dtype=jnp.float32) * 2.0 + 6.0
    weight = jnp.ones((output_size, input_size), dtype=jnp.float32)  # constant_(1.0)
    bias = jnp.ones((output_size,), dtype=jnp.float32)               # constant_(1.0)

    y = jax.block_until_ready(linear_forward(x, weight, bias))
    y_ref = x @ weight.T + bias
    assert y.shape == (batch, output_size)
    assert jnp.allclose(y, y_ref, atol=5e-2, rtol=1e-2), (y, y_ref)

    # Larger (still small) non-multiple shapes to exercise the (i, j, k) grid,
    # the K-reduction accumulator, and the padding/slicing path.
    k1, k2, k3 = jax.random.split(key, 3)
    n2, in2, out2 = 200, 640, 384
    x2 = jax.random.normal(k1, (n2, in2), dtype=jnp.float32)
    w2 = jax.random.normal(k2, (out2, in2), dtype=jnp.float32) * 0.05
    b2 = jax.random.normal(k3, (out2,), dtype=jnp.float32)
    y2 = jax.block_until_ready(linear_forward(x2, w2, b2))
    y2_ref = x2 @ w2.T + b2
    assert y2.shape == (n2, out2)
    assert jnp.allclose(y2, y2_ref, atol=5e-2, rtol=5e-2), float(
        jnp.max(jnp.abs(y2 - y2_ref))
    )

    print("KERNEL_OK")
</pallas_src>

<mosaic_0001>
module attributes {stable_mosaic.version = 11 : i64} {
  func.func @_linear_kernel(%arg0: i32, %arg1: i32, %arg2: i32, %arg3: memref<8x128xf32, #tpu.memory_space<vmem>>, %arg4: memref<128x128xf32, #tpu.memory_space<vmem>>, %arg5: memref<1x128xf32, #tpu.memory_space<vmem>>, %arg6: memref<8x128xf32, #tpu.memory_space<vmem>>, %arg7: memref<8x128xf32, #tpu.memory_space<vmem>>) attributes {dimension_semantics = [#tpu.dimension_semantics<parallel>, #tpu.dimension_semantics<parallel>, #tpu.dimension_semantics<arbitrary>], iteration_bounds = array<i64: 1, 1, 1>, scalar_prefetch = 0 : i64, scratch_operands = 1 : i64, tpu.core_type = #tpu.core_type<tc>, window_params = [{transform_indices = @transform_0, window_bounds = array<i64: 8, 128>}, {transform_indices = @transform_1, window_bounds = array<i64: 128, 128>}, {transform_indices = @transform_2, window_bounds = array<i64: 1, 128>}, {transform_indices = @transform_3, window_bounds = array<i64: 8, 128>}]} {
    %c0_i32 = arith.constant 0 : i32
    %0 = arith.cmpi eq, %arg2, %c0_i32 : i32
    %1 = arith.extui %0 : i1 to i32
    %c0_i32_0 = arith.constant 0 : i32
    %2 = arith.cmpi ne, %1, %c0_i32_0 : i32
    scf.if %2 {
      %cst_10 = arith.constant 0.000000e+00 : f32
      %12 = vector.broadcast %cst_10 : f32 to vector<8x128xf32>
      %c0_11 = arith.constant 0 : index
      %c0_12 = arith.constant 0 : index
      %13 = vector.load %arg7[%c0_11, %c0_12] : memref<8x128xf32, #tpu.memory_space<vmem>>, vector<8x128xf32>
      tpu.vector_store %arg7[%c0_11, %c0_12], %12 {strides = array<i32>} : memref<8x128xf32, #tpu.memory_space<vmem>>, vector<8x128xf32>,
    } else {
    }
    %c0 = arith.constant 0 : index
    %c0_1 = arith.constant 0 : index
    %3 = vector.load %arg7[%c0, %c0_1] : memref<8x128xf32, #tpu.memory_space<vmem>>, vector<8x128xf32>
    %c0_2 = arith.constant 0 : index
    %c0_3 = arith.constant 0 : index
    %4 = vector.load %arg3[%c0_2, %c0_3] : memref<8x128xf32, #tpu.memory_space<vmem>>, vector<8x128xf32>
    %c0_4 = arith.constant 0 : index
    %c0_5 = arith.constant 0 : index
    %5 = vector.load %arg4[%c0_4, %c0_5] : memref<128x128xf32, #tpu.memory_space<vmem>>, vector<128x128xf32>
    %cst = arith.constant dense<0.000000e+00> : vector<8x128xf32>
    %6 = tpu.matmul %4, %5, %cst {dimension_numbers = #tpu.dot_dimension_numbers<[1], [1], [0], [0], [0, 0, 1, 0], [], []>} : vector<8x128xf32>, vector<128x128xf32>, vector<8x128xf32> -> vector<8x128xf32>
    %7 = arith.addf %3, %6 : vector<8x128xf32>
    %c0_6 = arith.constant 0 : index
    %c0_7 = arith.constant 0 : index
    %8 = vector.load %arg7[%c0_6, %c0_7] : memref<8x128xf32, #tpu.memory_space<vmem>>, vector<8x128xf32>
    tpu.vector_store %arg7[%c0_6, %c0_7], %7 {strides = array<i32>} : memref<8x128xf32, #tpu.memory_space<vmem>>, vector<8x128xf32>,
    %c0_i32_8 = arith.constant 0 : i32
    %9 = arith.cmpi eq, %arg2, %c0_i32_8 : i32
    %10 = arith.extui %9 : i1 to i32
    %c0_i32_9 = arith.constant 0 : i32
    %11 = arith.cmpi ne, %10, %c0_i32_9 : i32
    scf.if %11 {
      %c0_10 = arith.constant 0 : index
      %c0_11 = arith.constant 0 : index
      %12 = vector.load %arg7[%c0_10, %c0_11] : memref<8x128xf32, #tpu.memory_space<vmem>>, vector<8x128xf32>
      %c0_12 = arith.constant 0 : index
      %c0_13 = arith.constant 0 : index
      %13 = vector.load %arg5[%c0_12, %c0_13] : memref<1x128xf32, #tpu.memory_space<vmem>>, vector<1x128xf32>
      %14 = vector.broadcast %13 : vector<1x128xf32> to vector<8x128xf32>
      %15 = arith.addf %12, %14 : vector<8x128xf32>
      %c0_14 = arith.constant 0 : index
      %c0_15 = arith.constant 0 : index
      %16 = vector.load %arg6[%c0_14, %c0_15] : memref<8x128xf32, #tpu.memory_space<vmem>>, vector<8x128xf32>
      tpu.vector_store %arg6[%c0_14, %c0_15], %15 {strides = array<i32>} : memref<8x128xf32, #tpu.memory_space<vmem>>, vector<8x128xf32>,
    } else {
    }
    return
  }
  func.func @transform_0(%arg0: i32, %arg1: i32, %arg2: i32) -> (i32, i32) {
    %c0_i32 = arith.constant 0 : i32
    return %arg0, %arg2 : i32, i32
  }
  func.func @transform_1(%arg0: i32, %arg1: i32, %arg2: i32) -> (i32, i32) {
    %c0_i32 = arith.constant 0 : i32
    return %arg1, %arg2 : i32, i32
  }
  func.func @transform_2(%arg0: i32, %arg1: i32, %arg2: i32) -> (i32, i32) {
    %c0_i32 = arith.constant 0 : i32
    %c0_i32_0 = arith.constant 0 : i32
    return %c0_i32, %arg1 : i32, i32
  }
  func.func @transform_3(%arg0: i32, %arg1: i32, %arg2: i32) -> (i32, i32) {
    %c0_i32 = arith.constant 0 : i32
    return %arg0, %arg1 : i32, i32
  }
}

</mosaic_0001>

<bundles_post_ra>
// kernel: linear_forward.1
= control target key start
LH: loop header
LB: loop body
LE: loop exit
PB: predicated region body
PF: predicated region fallthrough
CT: control target
= control target key end

     0   :  { %v181_v0 = vmov 0.0   ;;  %vm182_vm0 = vmmov 0   ;;  %s260_s1 = inlined_call_operand.vmem [shape: f32[128,128], index: 1, kind: input, shape index: {}]   ;;  %s261_s0 = inlined_call_operand.vmem [shape: f32[8,128], index: 0, kind: input, shape index: {}]   ;;  %s262_s2 = inlined_call_operand.vmem [shape: f32[1,128], index: 2, kind: input, shape index: {}]   ;;  %s263_s3 = inlined_call_operand.vmem [shape: f32[8,128], index: 3, kind: output, shape index: {}]  }
   0x1   :  { %144 = vmatprep.subr.mxu0 %v181_v0  ;;  %v36_v1 = vld [vmem:[%s260_s1 + $0x78] sm:$0xff]  ;;  %176 = vmatprep.mubr.msk.f32.mxu0 %vm182_vm0, %v181_v0  ;;  %v35_v2 = vld [vmem:[%s260_s1 + $0x70] sm:$0xff]  ;;  %v34_v3 = vld [vmem:[%s260_s1 + $0x68] sm:$0xff] }
   0x2   :  { %145 = vmatpush3.xpose.msra.mxu0 %v36_v1  ;;  %v33_v4 = vld [vmem:[%s260_s1 + $0x60] sm:$0xff]  ;;  %v32_v5 = vld [vmem:[%s260_s1 + $0x58] sm:$0xff]  ;;  %v31_v6 = vld [vmem:[%s260_s1 + $0x50] sm:$0xff] }
   0x3   :  { %146 = vmatprep.subr.mxu0 %v181_v0  ;;  %v30_v7 = vld [vmem:[%s260_s1 + $0x48] sm:$0xff]  ;;  %v29_v8 = vld [vmem:[%s260_s1 + $0x40] sm:$0xff]  ;;  %v28_v9 = vld [vmem:[%s260_s1 + $0x38] sm:$0xff] }
   0x4   :  { %v27_v10 = vld [vmem:[%s260_s1 + $0x30] sm:$0xff]  ;;  %v26_v11 = vld [vmem:[%s260_s1 + $0x28] sm:$0xff]  ;;  %v25_v12 = vld [vmem:[%s260_s1 + $0x20] sm:$0xff] }
   0x5   :  { %v24_v13 = vld [vmem:[%s260_s1 + $0x18] sm:$0xff]  ;;  %v23_v14 = vld [vmem:[%s260_s1 + $0x10] sm:$0xff]  ;;  %v22_v15 = vld [vmem:[%s260_s1 + $0x8] sm:$0xff] }
   0x6   :  { %147 = vmatpush3.xpose.msra.mxu0 %v35_v2  ;;  %v21_v16 = vld [vmem:[%s260_s1] sm:$0xff] }
   0x7   :  { %148 = vmatprep.subr.mxu0 %v181_v0  ;;  %v20_v17 = vld [vmem:[%s261_s0] sm:$0xff] }
   0x8   :  { %v126_v18 = vld [vmem:[%s262_s2] ss:$0 sm:$0xff] }
   0xa   :  { %149 = vmatpush3.xpose.msra.mxu0 %v34_v3 }
   0xb   :  { %150 = vmatprep.subr.mxu0 %v181_v0 }
   0xe   :  { %151 = vmatpush3.xpose.msra.mxu0 %v33_v4 }
   0xf   :  { %152 = vmatprep.subr.mxu0 %v181_v0 }
  0x12   :  { %153 = vmatpush3.xpose.msra.mxu0 %v32_v5 }
  0x13   :  { %154 = vmatprep.subr.mxu0 %v181_v0 }
  0x16   :  { %155 = vmatpush3.xpose.msra.mxu0 %v31_v6 }
  0x17   :  { %156 = vmatprep.subr.mxu0 %v181_v0 }
  0x1a   :  { %157 = vmatpush3.xpose.msra.mxu0 %v30_v7 }
  0x1b   :  { %158 = vmatprep.subr.mxu0 %v181_v0 }
  0x1e   :  { %159 = vmatpush3.xpose.msra.mxu0 %v29_v8 }
  0x1f   :  { %160 = vmatprep.subr.mxu0 %v181_v0 }
  0x22   :  { %161 = vmatpush3.xpose.msra.mxu0 %v28_v9 }
  0x23   :  { %162 = vmatprep.subr.mxu0 %v181_v0 }
  0x26   :  { %163 = vmatpush3.xpose.msra.mxu0 %v27_v10 }
  0x27   :  { %164 = vmatprep.subr.mxu0 %v181_v0 }
  0x2a   :  { %165 = vmatpush3.xpose.msra.mxu0 %v26_v11 }
  0x2b   :  { %166 = vmatprep.subr.mxu0 %v181_v0 }
  0x2e   :  { %167 = vmatpush3.xpose.msra.mxu0 %v25_v12 }
  0x2f   :  { %168 = vmatprep.subr.mxu0 %v181_v0 }
  0x32   :  { %169 = vmatpush3.xpose.msra.mxu0 %v24_v13 }
  0x33   :  { %170 = vmatprep.subr.mxu0 %v181_v0 }
  0x36   :  { %171 = vmatpush3.xpose.msra.mxu0 %v23_v14 }
  0x37   :  { %172 = vmatprep.subr.mxu0 %v181_v0 }
  0x3a   :  { %173 = vmatpush3.xpose.msra.mxu0 %v22_v15 }
  0x3b   :  { %174 = vmatprep.subr.mxu0 %v181_v0 }
  0x3e   :  { %175 = vmatpush3.xpose.msra.mxu0 %v21_v16 }
  0x41   :  { %177 = vmatmul.mubr.f32.vlgmr.msra.gmra.mxu0 %v20_v17 }
 0x101   :  { %v103_v19 = vpop.f32.mrf.mxu0 }
 0x102   :  { %v120_v20 = vadd.f32 %v126_v18, %v103_v19 }
 0x103   :  { %v178_v21 = vpop.f32.mrf.mxu0 }
 0x104   :  { %121 = vst [vmem:[%s263_s3] sm:$0xff] %v120_v20 }

</bundles_post_ra>
